<compile_context>
chip_gen: v5e
topology: v5e:2x2
jax: 0.10.0
libtpu: 0.0.40
codegen_flags: <defaults>
</compile_context>

<pallas_src>
import jax
import jax.numpy as jnp
from jax.experimental import pallas as pl
from jax.experimental.pallas import tpu as pltpu

# Nonzero taps of the Q2 mask [[1,1,1],[1,1,0],[1,0,0]].
_Q2_TAPS = ((0, 0), (0, 1), (0, 2), (1, 0), (1, 1), (2, 0))
_LANE = 128


def _round_up(a, b):
    return ((a + b - 1) // b) * b


def _pick_tile_hw(hw, k, c_out, in_itemsize):
    """VMEM-capped lane tile: multiple of 128, ~512-2048 wide, minimal padding."""
    budget = 12 * 1024 * 1024  # fits v5e's 16 MiB scoped-VMEM default with headroom
    per_lane = 2 * k * in_itemsize + 2 * c_out * 4  # dbl-buffered RHS + f32 output
    vmem_cap = max(_LANE, (budget // per_lane) // _LANE * _LANE)
    hi = min(2048, vmem_cap)
    if hw <= hi:
        return _round_up(hw, _LANE)
    lo = min(512, hi)
    best_t = hi
    best_waste = _round_up(hw, hi) - hw
    t = hi - _LANE
    while t >= lo:
        waste = _round_up(hw, t) - hw
        if waste < best_waste:
            best_t, best_waste = t, waste
        t -= _LANE
    return best_t


def _q2_matmul_kernel(w_ref, x_ref, b_ref, o_ref):
    """Fused MXU matmul + bias for one (image, lane-tile) block.

    w_ref : (c_out, 6*c_in)   fused masked weights, VMEM (resident across grid)
    x_ref : (6*c_in, tile_hw) lane-dense im2col RHS block, VMEM
    b_ref : (c_out, 1)        bias, VMEM (broadcasts over lanes)
    o_ref : (c_out, tile_hw)  lane-dense output block, VMEM
    """
    acc = jnp.dot(w_ref[...], x_ref[...], preferred_element_type=jnp.float32)
    o_ref[...] = (acc + b_ref[...]).astype(o_ref.dtype)


def q2_forward(x, weight, bias, dilation, *, compute_dtype=jnp.float32):
    """x: (N, C_in, H, W) f32. weight: (C_out, C_in, 3, 3). bias: (C_out,)."""
    N, c_in, H, W = x.shape
    c_out = weight.shape[0]
    d = dilation
    HW = H * W
    K = len(_Q2_TAPS) * c_in

    # ---- im2col in the wrapper (no big transposes) --------------------------
    # 'same'-style padding: pad = dilation keeps spatial size for a 3x3 kernel.
    x_pad = jnp.pad(x, ((0, 0), (0, 0), (d, d), (d, d)))
    patches = jnp.stack(
        [x_pad[:, :, ki * d: ki * d + H, kj * d: kj * d + W] for ki, kj in _Q2_TAPS],
        axis=1,
    )                                                      # (N, 6, c_in, H, W)
    # Contiguous reshape: K index = tap*c_in + c, lane index = h*W + w.
    rhs = patches.reshape(N, K, HW).astype(compute_dtype)  # (N, K, HW)

    # Fused weights for the 6 nonzero-mask taps (same K ordering as the RHS).
    w_fused = jnp.stack(
        [weight[:, :, ki, kj] for ki, kj in _Q2_TAPS], axis=1
    ).reshape(c_out, K).astype(compute_dtype)              # (c_out, 6*c_in)
    b_col = bias.reshape(c_out, 1).astype(jnp.float32)     # (c_out, 1)

    # ---- VMEM-capped lane tiling; pad HW up to a multiple of the tile -------
    itemsize = jnp.dtype(compute_dtype).itemsize
    tile_hw = _pick_tile_hw(HW, K, c_out, itemsize)
    HW_pad = _round_up(HW, tile_hw)
    if HW_pad != HW:
        rhs = jnp.pad(rhs, ((0, 0), (0, 0), (0, HW_pad - HW)))
    n_hw = HW_pad // tile_hw

    out = pl.pallas_call(
        _q2_matmul_kernel,
        out_shape=jax.ShapeDtypeStruct((N, c_out, HW_pad), x.dtype),
        grid=(N, n_hw),
        in_specs=[
            pl.BlockSpec((c_out, K), lambda n, j: (0, 0)),
            pl.BlockSpec((pl.Squeezed(), K, tile_hw), lambda n, j: (n, 0, j)),
            pl.BlockSpec((c_out, 1), lambda n, j: (0, 0)),
        ],
        out_specs=pl.BlockSpec(
            (pl.Squeezed(), c_out, tile_hw), lambda n, j: (n, 0, j)
        ),
        compiler_params=pltpu.CompilerParams(
            dimension_semantics=("parallel", "parallel")),
    )(w_fused, rhs, b_col)

    if HW_pad != HW:
        out = out[:, :, :HW]
    return out.reshape(N, c_out, H, W)                     # already NCHW order


def _reference(x, weight, bias, dilation):
    mask = jnp.array([[1.0, 1.0, 1.0],
                      [1.0, 1.0, 0.0],
                      [1.0, 0.0, 0.0]], dtype=jnp.float32)
    w = weight * mask[None, None, :, :]
    out = jax.lax.conv_general_dilated(
        x, w,
        window_strides=(1, 1),
        padding=[(dilation, dilation), (dilation, dilation)],
        rhs_dilation=(dilation, dilation),
        dimension_numbers=("NCHW", "OIHW", "NCHW"),
    )
    return out + bias[None, :, None, None]


if __name__ == "__main__":
    # Module config (synthetic, deterministic init — no checkpoint load).
    N, C_IN, C_OUT = 2, 4, 8
    H = W = 16
    DILATION = 2

    key = jax.random.PRNGKey(0)
    kx, kw, kb = jax.random.split(key, 3)

    x = jax.random.normal(kx, (N, C_IN, H, W), dtype=jnp.float32)
    # PyTorch Conv2d default init is kaiming-uniform; any deterministic init is fine.
    fan_in = C_IN * 3 * 3
    bound = 1.0 / (fan_in ** 0.5)
    weight = jax.random.uniform(
        kw, (C_OUT, C_IN, 3, 3), minval=-bound, maxval=bound, dtype=jnp.float32
    )
    bias = jax.random.uniform(
        kb, (C_OUT,), minval=-bound, maxval=bound, dtype=jnp.float32
    )

    ref = _reference(x, weight, bias, DILATION)

    # f32 path: must match the module's f32 conv semantics tightly.
    out = jax.block_until_ready(q2_forward(x, weight, bias, DILATION))
    assert out.shape == (N, C_OUT, H, W)
    assert jnp.allclose(out, ref, atol=1e-4, rtol=1e-4), "mismatch vs XLA conv reference"

    # bf16-RHS path (halves HBM traffic on v6e/v7x; f32 MXU accumulation).
    out_bf16 = jax.block_until_ready(
        q2_forward(x, weight, bias, DILATION, compute_dtype=jnp.bfloat16)
    )
    assert jnp.allclose(out_bf16, ref, atol=5e-2, rtol=5e-2), "bf16 path out of tolerance"

    print("KERNEL_OK")
</pallas_src>

<mosaic_0001>
module attributes {stable_mosaic.version = 11 : i64} {
  func.func @_q2_matmul_kernel(%arg0: i32, %arg1: i32, %arg2: memref<8x24xf32, #tpu.memory_space<vmem>>, %arg3: memref<1x24x256xf32, #tpu.memory_space<vmem>>, %arg4: memref<8x1xf32, #tpu.memory_space<vmem>>, %arg5: memref<1x8x256xf32, #tpu.memory_space<vmem>>) attributes {dimension_semantics = [#tpu.dimension_semantics<parallel>, #tpu.dimension_semantics<parallel>], iteration_bounds = array<i64: 2, 1>, scalar_prefetch = 0 : i64, scratch_operands = 0 : i64, tpu.core_type = #tpu.core_type<tc>, window_params = [{pipeline_mode = #tpu.pipeline_mode<synchronous>, transform_indices = @transform_0, window_bounds = array<i64: 8, 24>}, {transform_indices = @transform_1, window_bounds = array<i64: 1, 24, 256>}, {pipeline_mode = #tpu.pipeline_mode<synchronous>, transform_indices = @transform_2, window_bounds = array<i64: 8, 1>}, {transform_indices = @transform_3, window_bounds = array<i64: 1, 8, 256>}]} {
    %c0 = arith.constant 0 : index
    %c0_0 = arith.constant 0 : index
    %0 = vector.load %arg2[%c0, %c0_0] : memref<8x24xf32, #tpu.memory_space<vmem>>, vector<8x24xf32>
    %c0_1 = arith.constant 0 : index
    %c0_2 = arith.constant 0 : index
    %c0_3 = arith.constant 0 : index
    %1 = vector.load %arg3[%c0_1, %c0_2, %c0_3] : memref<1x24x256xf32, #tpu.memory_space<vmem>>, vector<1x24x256xf32>
    %2 = vector.shape_cast %1 : vector<1x24x256xf32> to vector<24x256xf32>
    %cst = arith.constant dense<0.000000e+00> : vector<8x256xf32>
    %3 = tpu.matmul %0, %2, %cst {dimension_numbers = #tpu.dot_dimension_numbers<[1], [0], [0], [1], [0, 0, 1, 1], [], []>} : vector<8x24xf32>, vector<24x256xf32>, vector<8x256xf32> -> vector<8x256xf32>
    %c0_4 = arith.constant 0 : index
    %c0_5 = arith.constant 0 : index
    %4 = vector.load %arg4[%c0_4, %c0_5] : memref<8x1xf32, #tpu.memory_space<vmem>>, vector<8x1xf32>
    %5 = vector.broadcast %4 : vector<8x1xf32> to vector<8x256xf32>
    %6 = arith.addf %3, %5 : vector<8x256xf32>
    %c0_6 = arith.constant 0 : index
    %c0_7 = arith.constant 0 : index
    %c0_8 = arith.constant 0 : index
    %7 = vector.load %arg5[%c0_6, %c0_7, %c0_8] : memref<1x8x256xf32, #tpu.memory_space<vmem>>, vector<1x8x256xf32>
    %8 = vector.shape_cast %7 : vector<1x8x256xf32> to vector<8x256xf32>
    %9 = vector.shape_cast %6 : vector<8x256xf32> to vector<1x8x256xf32>
    tpu.vector_store %arg5[%c0_6, %c0_7, %c0_8], %9 {strides = array<i32>} : memref<1x8x256xf32, #tpu.memory_space<vmem>>, vector<1x8x256xf32>,
    return
  }
  func.func @transform_0(%arg0: i32, %arg1: i32) -> (i32, i32) {
    %c0_i32 = arith.constant 0 : i32
    %c0_i32_0 = arith.constant 0 : i32
    %c0_i32_1 = arith.constant 0 : i32
    return %c0_i32, %c0_i32_0 : i32, i32
  }
  func.func @transform_1(%arg0: i32, %arg1: i32) -> (i32, i32, i32) {
    %c0_i32 = arith.constant 0 : i32
    %c0_i32_0 = arith.constant 0 : i32
    return %arg0, %c0_i32, %arg1 : i32, i32, i32
  }
  func.func @transform_2(%arg0: i32, %arg1: i32) -> (i32, i32) {
    %c0_i32 = arith.constant 0 : i32
    %c0_i32_0 = arith.constant 0 : i32
    %c0_i32_1 = arith.constant 0 : i32
    return %c0_i32, %c0_i32_0 : i32, i32
  }
  func.func @transform_3(%arg0: i32, %arg1: i32) -> (i32, i32, i32) {
    %c0_i32 = arith.constant 0 : i32
    %c0_i32_0 = arith.constant 0 : i32
    return %arg0, %c0_i32, %arg1 : i32, i32, i32
  }
}

</mosaic_0001>

<bundles_post_ra>
// kernel: tpu_custom_call.1
= control target key start
LH: loop header
LB: loop body
LE: loop exit
PB: predicated region body
PF: predicated region fallthrough
CT: control target
= control target key end

     0   :  { %8 = vsyncpa [#allocation3], 0  ;;  %s721_s0 = inlined_call_operand.vmem [shape: f32[8,24], index: 0, kind: input, shape index: {}]   ;;  %s722_s1 = inlined_call_operand.hbm [shape: f32[2,24,256], index: 1, kind: input, shape index: {}]   ;;  %s723_s2 = inlined_call_operand.vmem [shape: f32[8,1], index: 2, kind: input, shape index: {}]   ;;  %s724_s3 = inlined_call_operand.hbm [shape: f32[2,8,256], index: 3, kind: output, shape index: {}]  }
   0x1   :  { %10 = vsyncpa [#allocation3 + $0x1], 0 }
   0x2   :  { %11 = vsyncpa [#allocation4], 0 }
   0x3   :  { %13 = vsyncpa [#allocation4 + $0x1], 0  ;;  %s594_s12 = smov 0   ;;  %s596_s13 = smov 0  }
   0x4   :  { %s598_s14 = smov 0   ;;  %s600_s15 = smov 0  }
   0x5   :  { %s602_s16 = smov 0   ;;  %s604_s17 = smov 0  }
   0x6 LB: > { %s373_s18 = sadd.s32 4294967295, %s569_s17   ;;  %s374_s19 = sadd.s32 4294967294, %s569_s17   ;;  %s569_s17 = sphi %s604_s17, %s19_s17   ;;  %s565_s16 = sphi %s602_s16, %s733_s16   ;;  %s561_s15 = sphi %s600_s15, %s732_s15   ;;  %s557_s14 = sphi %s598_s14, %s731_s14   ;;  %s553_s13 = sphi %s596_s13, %s730_s13   ;;  %s549_s12 = sphi %s594_s12, %s729_s12  }
   0x7   : > { %s31_s20 = sadd.s32 1, %s565_s16  ;;  %s61_s21 = sadd.s32 1, %s557_s14 }
   0x8   : > { %p33_p0 = scmp.ge.s32.totalorder %s31_s20, 2  ;;  %p68_p1 = scmp.ne.s32.totalorder %s557_s14, %s553_s13 }
   0x9   : > { %p69_p2 = scmp.eq.s32.totalorder %s569_s17, 0  ;;  %p74_p3 = scmp.ne.s32.totalorder %s553_s13, %s549_s12 }
   0xa   : > { %s735_s20 = smov (%p33_p0, %s31_s20), 0  ;;  %p75_p5 = scmp.eq.s32.totalorder %s373_s18, 0 }
   0xb   : > { %p635_p4 = por %p69_p2, %p68_p1  ;;  %s56_s23 = ssub.s32 %s565_s16, %s735_s20 }
   0xc   : > { %p121_p6 = scmp.eq.s32.totalorder %s373_s18, 1  ;;  %p59_p7 = scmp.eq.s32.totalorder %s56_s23, 0 }
   0xd   : > { %p641_p8 = por %p75_p5, %p74_p3  ;;  %p127_p10 = scmp.eq.s32.totalorder %s374_s19, 1 }
   0xe   : > { %p645_p9 = por %p121_p6, %p68_p1  ;;  %p376_p12 = scmp.ge.s32.totalorder %s569_s17, 2 }
   0xf   : > { %s650_s26 = scalar_select %p59_p7, %s557_s14, %s61_s21  }
  0x10   : > { %p652_p11 = por %p127_p10, %p74_p3  ;;  %p403_p13 = scmp.lt.s32.totalorder %s569_s17, 2 }
  0x11   : > { %s153_s28 = sand.u32 1, %s557_s14   ;;  %s389_s30 = smul.u32 48, %s565_s16 }
  0x12   : > { %s388_s29 = smul.u32 48, %s153_s28  ;;  %p396_p0 = pnand %p403_p13, %p635_p4 }
  0x13   : > { %s164_s6 = scalar_lea.hbm %s722_s1, %s389_s30  ;;  %p378_p1 = scmp.ge.s32.totalorder %s569_s17, 1 }
  0x14   : > { %s157_s7 = scalar_lea.vmem [#allocation2], %s388_s29  ;;  %s165_s9 = sshll.u32 %s164_s6, 4  ;;  %s166_s9 = int_to_ptr.hbm [resolvable:$true] %s165_s9 }
  0x15   : > { %s167_s8 = sshll.u32 %s157_s7, 4  ;;  %s154_s10 = scalar_lea.sflag [#allocation3], %s153_s28  ;;  %s168_s8 = int_to_ptr.vmem [resolvable:$true] %s167_s8 }
  0x16   : > { %s571_s11 = smov 256   ;;  %s572_s18 = smov 16  }
  0x17   : > { %398 = dma.hbm_to_vmem [thread:$0]  (!%p396_p0), %s166_s9, 768, %s168_s8, %s154_s10, %s571_s11, %s571_s11, %s572_s18  }
  0x18   : > { %p175_p2 = scmp.lt.s32.totalorder %s569_s17, 3 }
  0x1a   : > { %p176_p3 = pnand %p378_p1, %p175_p2 }
  0x1b   : > { %s668_s19 = sand.u32 (!%p176_p3), 1, %s553_s13  }
  0x1c   : > { %179 = sbr.rel (%p176_p3) target bundleno = 172 (0xac), region = 32  ;;  %s182_s22 = scalar_lea.sflag (!%p176_p3), [#allocation3], %s668_s19 }
  0x1d   : > { %s390_s21 = smul.u32 (!%p176_p3), 48, %s668_s19 }
  0x1f   : > { %s185_s23 = scalar_lea.vmem (!%p176_p3), [#allocation2], %s390_s21 }
  0x21   : > { %540 = dma.done.wait (%p641_p8), %s182_s22, 768  }
  0x22   : > { %542 = vsyncadd (%p641_p8), %s182_s22, 4294966528  ;;  %v573_v0 = vmov 0   ;;  %v216_v1 = vld [vmem:[%s185_s23 + $0x20] sm:$0xff]  ;;  %v217_v2 = vld [vmem:[%s185_s23 + $0x28] sm:$0xff]  ;;  %vm224_vm0 = vcmask 195584   ;;  %s379_s4 = sshll.u32 %s668_s19, 4 }
  0x23   : > { %456 = vset.pattern.permute.xlu0 %v573_v0  ;;  %v214_v3 = vld [vmem:[%s185_s23 + $0x10] sm:$0xff]  ;;  %241 = vmatpush.msra.mxu0 %v216_v1  ;;  %v215_v4 = vld [vmem:[%s185_s23 + $0x18] sm:$0xff]  ;;  %v212_v5 = vld [vmem:[%s185_s23] sm:$0xff]  ;;  %s387_s5 = sshll.u32 %s561_s15, 4  ;;  %s208_s9 = scalar_lea.vmem [#allocation5], %s379_s4 }
  0x24   : > { %261 = vmatpush.msra.mxu1 %v217_v2  ;;  %v213_v6 = vld [vmem:[%s185_s23 + $0x8] sm:$0xff]  ;;  %v218_v7 = vld [vmem:[%s723_s2] sm:$0xff]  ;;  %s284_s8 = scalar_lea.hbm %s724_s3, %s387_s5  ;;  %s286_s10 = sshll.u32 %s208_s9, 4  ;;  %s287_s10 = int_to_ptr.vmem [resolvable:$true] %s286_s10 }
  0x25   : > { %242 = vmatpush.msra.mxu0 %v214_v3  ;;  %v211_v8 = vld [vmem:[%s721_s0] sm:$0xff]  ;;  %221 = vperm.xlu0 %456, %v218_v7   ;;  %s288_s11 = sshll.u32 %s284_s8, 4  ;;  %s271_s18 = scalar_lea.sflag [#allocation4], %s668_s19  ;;  %s289_s11 = int_to_ptr.hbm [resolvable:$true] %s288_s11 }
  0x26   : > { %262 = vmatpush.msra.mxu1 %v215_v4  ;;  %s501_s21 = sshra.s32 %s289_s11, 4  ;;  %s507_s28 = scalar_lea.hbm %s724_s3, 32  ;;  %s502_s21 = int_to_ptr.hbm [resolvable:$true] %s501_s21 }
  0x27   : > { %243 = vmatpush.msra.mxu0 %v212_v5  ;;  %s503_s15 = scalar_lea.hbm %s502_s21, 16  ;;  %p508_p7 = scmp.lt.s32.totalorder %s502_s21, %s724_s3 }
  0x28   : > { %263 = vmatpush.msra.mxu1 %v213_v6  ;;  %380 = vmatmul.msk.f32.vlgmr.msra.gmra.mxu0 %vm224_vm0, %v211_v8  ;;  %p504_p4 = scmp.ne.s32.totalorder %s502_s21, %s503_s15  ;;  %p509_p8 = scmp.lt.s32.totalorder %s507_s28, %s503_s15 }
  0x29   : > { %381 = vmatmul.msk.f32.vlgmr.msra.gmra.mxu1 %vm224_vm0, %v211_v8 }
  0x2a   : > { %p505_p5 = pnand %p504_p4, %p645_p9  ;;  %p510_p10 = por %p509_p8, %p508_p7 }
  0x2c   : > { %p506_p6 = pneg %p505_p5 }
  0x2e   : > { %p511_p13 = pnand %p510_p10, %p506_p6 }
  0x97   : > { %v222_v9 = vpop.permute.xlu0 %221 }
  0xa5   : > { %v245_v10 = vpop.f32.mrf.mxu0 }
  0xa6   : > { %v265_v11 = vpop.f32.mrf.mxu1  ;;  %v246_v12 = vadd.f32 %v245_v10, %v222_v9 }
  0xa7   : > { %v266_v13 = vadd.f32 %v265_v11, %v222_v9 }
  0xa8   : > { %268 = vst [vmem:[%s208_s9] sm:$0xff] %v246_v12 }
  0xa9   : > { %269 = vst [vmem:[%s208_s9 + $0x8] sm:$0xff] %v266_v13 }
  0xaa   : > { %514 = shalt.err (!%p511_p13)
}
  0xab   : > { %393 = dma.vmem_to_hbm [thread:$0]  (%p645_p9), %s287_s10, 256, %s289_s11, %s271_s18  }
  0xac PF: > { %s300_s19 = sand.u32 1, %s549_s12   ;;  %p400_p0 = pnand %p376_p12, %p652_p11 }
  0xad   : > { %s301_s30 = scalar_lea.sflag [#allocation4], %s300_s19 }
  0xae   : > { %p401_p1 = pneg %p400_p0 }
  0xb0   : > { %544 = dma.done.wait (%p401_p1), %s301_s30, 256  }
  0xb1   : > { %546 = vsyncadd (%p401_p1), %s301_s30, 4294967040  ;;  %s19_s17 = sadd.s32 1, %s569_s17   ;;  %s729_s12 = smov %s553_s13 }
  0xb2   : > { %p16_p2 = scmp.ge.s32.totalorder %s19_s17, 4   ;;  %s730_s13 = smov %s557_s14 }
  0xb3   : > { %s731_s14 = smov %s650_s26  ;;  %s732_s15 = smov %s565_s16 }
  0xb4   : > { %s733_s16 = smov %s735_s20  ;;  %18 = sbr.rel (!%p16_p2) target bundleno = 6 (0x6), region = 77 }
  0xb9   :  { %307 = vsyncpa [#allocation3], 1 }
  0xba   :  { %309 = vsyncpa [#allocation3 + $0x1], 1 }
  0xbb   :  { %310 = vsyncpa [#allocation4], 1 }
  0xbc   :  { %312 = vsyncpa [#allocation4 + $0x1], 1 }

</bundles_post_ra>
